<compile_context>
chip_gen: v6e
topology: v6e:2x2x1
jax: 0.10.0
libtpu: 0.0.40
codegen_flags: <defaults>
</compile_context>

<pallas_src>
import functools
import math

import jax
import jax.numpy as jnp
from jax import lax
from jax.experimental import pallas as pl
from jax.experimental.pallas import tpu as pltpu


def _round_up(n, m):
    return -(-n // m) * m


# ---------------------------------------------------------------------------
# General path: per-row DMA gather, HBM table -> VMEM output block (no scratch)
# ---------------------------------------------------------------------------
def _dma_gather_kernel(idx_ref, emb_hbm, out_ref, sem, *, chunk):
    # idx_ref : (n_pad,) int32 in SMEM (scalar prefetch) -- drives the gather
    # emb_hbm : (V, D) table left in HBM (memory_space=pl.ANY, no auto-DMA)
    # out_ref : (tb, D) VMEM output block; row DMAs land here directly
    # sem     : (chunk,) DMA semaphores, reused chunk-by-chunk
    i = pl.program_id(0)
    tb = out_ref.shape[0]
    base = i * tb
    n_chunks = tb // chunk

    def row_copy(r, j):
        row = idx_ref[base + r]
        return pltpu.make_async_copy(
            emb_hbm.at[pl.ds(row, 1), :],
            out_ref.at[pl.ds(r, 1), :],
            sem.at[j],
        )

    def chunk_body(c, carry):
        # Keep `chunk` row DMAs in flight, then drain before reusing the sems.
        for j in range(chunk):
            row_copy(c * chunk + j, j).start()
        for j in range(chunk):
            row_copy(c * chunk + j, j).wait()
        return carry

    if n_chunks == 1:
        chunk_body(0, None)          # static indices for the single-chunk case
    else:
        lax.fori_loop(0, n_chunks, chunk_body, None)
    # Padded tail rows (last block) gather row 0 -- valid, sliced off by the
    # wrapper, so the whole out block is always fully written before writeback.


# ---------------------------------------------------------------------------
# Small fast path: VMEM-resident table + dynamic-slice gather (no per-row DMA)
# ---------------------------------------------------------------------------
def _vmem_gather_kernel(idx_ref, emb_ref, out_ref):
    # idx_ref : (n_pad,) int32 in SMEM; emb_ref : (V, D) VMEM-resident table
    i = pl.program_id(0)
    tb = out_ref.shape[0]
    base = i * tb
    for j in range(tb):  # tb <= 64 on this path -> cheap static unroll
        row = idx_ref[base + j]
        out_ref[pl.ds(j, 1), :] = emb_ref[pl.ds(row, 1), :]


def embedding_lookup(x, embedding, *, token_block=256,
                     vmem_budget_bytes=8 * 1024 * 1024,
                     force_dma=False):
    """x: (B, S) int indices, embedding: (V, D) float -> (B, S, D).

    Like torch.nn.Embedding, out-of-range indices are an error (they trip the
    DMA bounds check on the gather path) rather than being silently zeroed.
    """
    B, S = x.shape
    V, D = embedding.shape
    N = B * S
    itemsize = jnp.dtype(embedding.dtype).itemsize

    idx_flat = x.reshape(-1).astype(jnp.int32)

    small_table = V * D * itemsize <= 2 * 1024 * 1024
    small_batch = _round_up(N, 8) <= 64
    use_vmem_path = small_table and small_batch and not force_dma

    if use_vmem_path:
        tb = _round_up(N, 8)
    else:
        # Double-buffered (tb, D) output block must fit the VMEM budget; keep
        # tb a multiple of 8 (sublane tiling) and no larger than needed.
        max_tb = max(8, (vmem_budget_bytes // (2 * D * itemsize)) // 8 * 8)
        tb = max(8, min(_round_up(token_block, 8), max_tb, _round_up(N, 8)))

    n_blocks = _round_up(N, tb) // tb
    n_pad = n_blocks * tb
    if n_pad != N:
        # Pad with index 0 (valid row); padded rows are sliced off below.
        idx_flat = jnp.pad(idx_flat, (0, n_pad - N))

    # Explicit scoped-VMEM cap: stays within v5e's 16 MiB scoped default when
    # possible and never exceeds v7x's 64 MiB physical VMEM per TensorCore.
    vmem_limit = int(min(64 * 2 ** 20,
                         max(16 * 2 ** 20, 4 * tb * D * itemsize + (1 << 20))))
    cparams = pltpu.CompilerParams(
        dimension_semantics=("parallel",),
        vmem_limit_bytes=vmem_limit,
    )
    out_shape = jax.ShapeDtypeStruct((n_pad, D), embedding.dtype)

    if use_vmem_path:
        out_flat = pl.pallas_call(
            _vmem_gather_kernel,
            out_shape=out_shape,
            grid_spec=pltpu.PrefetchScalarGridSpec(
                num_scalar_prefetch=1,                       # idx_flat -> SMEM
                grid=(n_blocks,),
                in_specs=[pl.BlockSpec((V, D), lambda i, idx: (0, 0))],
                out_specs=pl.BlockSpec((tb, D), lambda i, idx: (i, 0)),
            ),
            compiler_params=cparams,
        )(idx_flat, embedding)
    else:
        chunk = 16 if tb % 16 == 0 else 8
        out_flat = pl.pallas_call(
            functools.partial(_dma_gather_kernel, chunk=chunk),
            out_shape=out_shape,
            grid_spec=pltpu.PrefetchScalarGridSpec(
                num_scalar_prefetch=1,                       # idx_flat -> SMEM
                grid=(n_blocks,),
                in_specs=[pl.BlockSpec(memory_space=pl.ANY)],  # table in HBM
                out_specs=pl.BlockSpec((tb, D), lambda i, idx: (i, 0)),
                scratch_shapes=[pltpu.SemaphoreType.DMA((chunk,))],
            ),
            compiler_params=cparams,
        )(idx_flat, embedding)

    return out_flat[:N].reshape(B, S, D)


def init_embedding(key, vocab_dim, dim, dtype=jnp.float32):
    """Equivalent of kaiming_uniform_(a=sqrt(5)) on a (V, D) tensor.

    PyTorch: fan_in = dim, gain = sqrt(2 / (1 + 5)) = sqrt(1/3),
             bound = gain * sqrt(3 / fan_in) = 1 / sqrt(dim).
    """
    bound = 1.0 / math.sqrt(dim)
    return jax.random.uniform(
        key, (vocab_dim, dim), dtype=dtype, minval=-bound, maxval=bound
    )


if __name__ == "__main__":
    key = jax.random.PRNGKey(0)
    k_emb, k_idx = jax.random.split(key)

    batch, seq, dim, vocab_dim = 2, 8, 32, 64

    embedding = init_embedding(k_emb, vocab_dim, dim)
    x = jax.random.randint(k_idx, (batch, seq), minval=0, maxval=vocab_dim,
                           dtype=jnp.int32)

    ref = embedding[x]   # plain JAX gather reference (bit-exact row copy)

    # Default dispatch -> small-table VMEM fast path.
    out_fast = jax.block_until_ready(embedding_lookup(x, embedding))
    assert out_fast.shape == (batch, seq, dim)
    assert jnp.array_equal(out_fast, ref), "VMEM fast path mismatch vs reference"

    # Force the general HBM DMA-gather path as well.
    out_dma = jax.block_until_ready(
        embedding_lookup(x, embedding, force_dma=True))
    assert jnp.array_equal(out_dma, ref), "DMA gather path mismatch vs reference"

    print("KERNEL_OK")
</pallas_src>

<mosaic_0001>
module attributes {stable_mosaic.version = 11 : i64} {
  func.func @_vmem_gather_kernel(%arg0: i32, %arg1: memref<16xi32, #tpu.memory_space<smem>>, %arg2: memref<64x32xf32, #tpu.memory_space<vmem>>, %arg3: memref<16x32xf32, #tpu.memory_space<vmem>>) attributes {dimension_semantics = [#tpu.dimension_semantics<parallel>], iteration_bounds = array<i64: 1>, scalar_prefetch = 1 : i64, scratch_operands = 0 : i64, tpu.core_type = #tpu.core_type<tc>, window_params = [{pipeline_mode = #tpu.pipeline_mode<synchronous>, transform_indices = @transform_0, window_bounds = array<i64: 64, 32>}, {transform_indices = @transform_1, window_bounds = array<i64: 16, 32>}]} {
    %c16_i32 = arith.constant 16 : i32
    %0 = arith.muli %arg0, %c16_i32 : i32
    %c0_i32 = arith.constant 0 : i32
    %1 = arith.addi %0, %c0_i32 : i32
    %2 = arith.index_cast %1 : i32 to index
    %3 = memref.load %arg1[%2] : memref<16xi32, #tpu.memory_space<smem>>
    %4 = arith.index_cast %3 : i32 to index
    %c0 = arith.constant 0 : index
    %5 = vector.load %arg2[%4, %c0] : memref<64x32xf32, #tpu.memory_space<vmem>>, vector<1x32xf32>
    %c0_0 = arith.constant 0 : index
    %c0_1 = arith.constant 0 : index
    %6 = vector.load %arg3[%c0_0, %c0_1] : memref<16x32xf32, #tpu.memory_space<vmem>>, vector<1x32xf32>
    tpu.vector_store %arg3[%c0_0, %c0_1], %5 {strides = array<i32>} : memref<16x32xf32, #tpu.memory_space<vmem>>, vector<1x32xf32>,
    %c1_i32 = arith.constant 1 : i32
    %7 = arith.addi %0, %c1_i32 : i32
    %8 = arith.index_cast %7 : i32 to index
    %9 = memref.load %arg1[%8] : memref<16xi32, #tpu.memory_space<smem>>
    %10 = arith.index_cast %9 : i32 to index
    %c0_2 = arith.constant 0 : index
    %11 = vector.load %arg2[%10, %c0_2] : memref<64x32xf32, #tpu.memory_space<vmem>>, vector<1x32xf32>
    %c1 = arith.constant 1 : index
    %c0_3 = arith.constant 0 : index
    %12 = vector.load %arg3[%c1, %c0_3] : memref<16x32xf32, #tpu.memory_space<vmem>>, vector<1x32xf32>
    tpu.vector_store %arg3[%c1, %c0_3], %11 {strides = array<i32>} : memref<16x32xf32, #tpu.memory_space<vmem>>, vector<1x32xf32>,
    %c2_i32 = arith.constant 2 : i32
    %13 = arith.addi %0, %c2_i32 : i32
    %14 = arith.index_cast %13 : i32 to index
    %15 = memref.load %arg1[%14] : memref<16xi32, #tpu.memory_space<smem>>
    %16 = arith.index_cast %15 : i32 to index
    %c0_4 = arith.constant 0 : index
    %17 = vector.load %arg2[%16, %c0_4] : memref<64x32xf32, #tpu.memory_space<vmem>>, vector<1x32xf32>
    %c2 = arith.constant 2 : index
    %c0_5 = arith.constant 0 : index
    %18 = vector.load %arg3[%c2, %c0_5] : memref<16x32xf32, #tpu.memory_space<vmem>>, vector<1x32xf32>
    tpu.vector_store %arg3[%c2, %c0_5], %17 {strides = array<i32>} : memref<16x32xf32, #tpu.memory_space<vmem>>, vector<1x32xf32>,
    %c3_i32 = arith.constant 3 : i32
    %19 = arith.addi %0, %c3_i32 : i32
    %20 = arith.index_cast %19 : i32 to index
    %21 = memref.load %arg1[%20] : memref<16xi32, #tpu.memory_space<smem>>
    %22 = arith.index_cast %21 : i32 to index
    %c0_6 = arith.constant 0 : index
    %23 = vector.load %arg2[%22, %c0_6] : memref<64x32xf32, #tpu.memory_space<vmem>>, vector<1x32xf32>
    %c3 = arith.constant 3 : index
    %c0_7 = arith.constant 0 : index
    %24 = vector.load %arg3[%c3, %c0_7] : memref<16x32xf32, #tpu.memory_space<vmem>>, vector<1x32xf32>
    tpu.vector_store %arg3[%c3, %c0_7], %23 {strides = array<i32>} : memref<16x32xf32, #tpu.memory_space<vmem>>, vector<1x32xf32>,
    %c4_i32 = arith.constant 4 : i32
    %25 = arith.addi %0, %c4_i32 : i32
    %26 = arith.index_cast %25 : i32 to index
    %27 = memref.load %arg1[%26] : memref<16xi32, #tpu.memory_space<smem>>
    %28 = arith.index_cast %27 : i32 to index
    %c0_8 = arith.constant 0 : index
    %29 = vector.load %arg2[%28, %c0_8] : memref<64x32xf32, #tpu.memory_space<vmem>>, vector<1x32xf32>
    %c4 = arith.constant 4 : index
    %c0_9 = arith.constant 0 : index
    %30 = vector.load %arg3[%c4, %c0_9] : memref<16x32xf32, #tpu.memory_space<vmem>>, vector<1x32xf32>
    tpu.vector_store %arg3[%c4, %c0_9], %29 {strides = array<i32>} : memref<16x32xf32, #tpu.memory_space<vmem>>, vector<1x32xf32>,
    %c5_i32 = arith.constant 5 : i32
    %31 = arith.addi %0, %c5_i32 : i32
    %32 = arith.index_cast %31 : i32 to index
    %33 = memref.load %arg1[%32] : memref<16xi32, #tpu.memory_space<smem>>
    %34 = arith.index_cast %33 : i32 to index
    %c0_10 = arith.constant 0 : index
    %35 = vector.load %arg2[%34, %c0_10] : memref<64x32xf32, #tpu.memory_space<vmem>>, vector<1x32xf32>
    %c5 = arith.constant 5 : index
    %c0_11 = arith.constant 0 : index
    %36 = vector.load %arg3[%c5, %c0_11] : memref<16x32xf32, #tpu.memory_space<vmem>>, vector<1x32xf32>
    tpu.vector_store %arg3[%c5, %c0_11], %35 {strides = array<i32>} : memref<16x32xf32, #tpu.memory_space<vmem>>, vector<1x32xf32>,
    %c6_i32 = arith.constant 6 : i32
    %37 = arith.addi %0, %c6_i32 : i32
    %38 = arith.index_cast %37 : i32 to index
    %39 = memref.load %arg1[%38] : memref<16xi32, #tpu.memory_space<smem>>
    %40 = arith.index_cast %39 : i32 to index
    %c0_12 = arith.constant 0 : index
    %41 = vector.load %arg2[%40, %c0_12] : memref<64x32xf32, #tpu.memory_space<vmem>>, vector<1x32xf32>
    %c6 = arith.constant 6 : index
    %c0_13 = arith.constant 0 : index
    %42 = vector.load %arg3[%c6, %c0_13] : memref<16x32xf32, #tpu.memory_space<vmem>>, vector<1x32xf32>
    tpu.vector_store %arg3[%c6, %c0_13], %41 {strides = array<i32>} : memref<16x32xf32, #tpu.memory_space<vmem>>, vector<1x32xf32>,
    %c7_i32 = arith.constant 7 : i32
    %43 = arith.addi %0, %c7_i32 : i32
    %44 = arith.index_cast %43 : i32 to index
    %45 = memref.load %arg1[%44] : memref<16xi32, #tpu.memory_space<smem>>
    %46 = arith.index_cast %45 : i32 to index
    %c0_14 = arith.constant 0 : index
    %47 = vector.load %arg2[%46, %c0_14] : memref<64x32xf32, #tpu.memory_space<vmem>>, vector<1x32xf32>
    %c7 = arith.constant 7 : index
    %c0_15 = arith.constant 0 : index
    %48 = vector.load %arg3[%c7, %c0_15] : memref<16x32xf32, #tpu.memory_space<vmem>>, vector<1x32xf32>
    tpu.vector_store %arg3[%c7, %c0_15], %47 {strides = array<i32>} : memref<16x32xf32, #tpu.memory_space<vmem>>, vector<1x32xf32>,
    %c8_i32 = arith.constant 8 : i32
    %49 = arith.addi %0, %c8_i32 : i32
    %50 = arith.index_cast %49 : i32 to index
    %51 = memref.load %arg1[%50] : memref<16xi32, #tpu.memory_space<smem>>
    %52 = arith.index_cast %51 : i32 to index
    %c0_16 = arith.constant 0 : index
    %53 = vector.load %arg2[%52, %c0_16] : memref<64x32xf32, #tpu.memory_space<vmem>>, vector<1x32xf32>
    %c8 = arith.constant 8 : index
    %c0_17 = arith.constant 0 : index
    %54 = vector.load %arg3[%c8, %c0_17] : memref<16x32xf32, #tpu.memory_space<vmem>>, vector<1x32xf32>
    tpu.vector_store %arg3[%c8, %c0_17], %53 {strides = array<i32>} : memref<16x32xf32, #tpu.memory_space<vmem>>, vector<1x32xf32>,
    %c9_i32 = arith.constant 9 : i32
    %55 = arith.addi %0, %c9_i32 : i32
    %56 = arith.index_cast %55 : i32 to index
    %57 = memref.load %arg1[%56] : memref<16xi32, #tpu.memory_space<smem>>
    %58 = arith.index_cast %57 : i32 to index
    %c0_18 = arith.constant 0 : index
    %59 = vector.load %arg2[%58, %c0_18] : memref<64x32xf32, #tpu.memory_space<vmem>>, vector<1x32xf32>
    %c9 = arith.constant 9 : index
    %c0_19 = arith.constant 0 : index
    %60 = vector.load %arg3[%c9, %c0_19] : memref<16x32xf32, #tpu.memory_space<vmem>>, vector<1x32xf32>
    tpu.vector_store %arg3[%c9, %c0_19], %59 {strides = array<i32>} : memref<16x32xf32, #tpu.memory_space<vmem>>, vector<1x32xf32>,
    %c10_i32 = arith.constant 10 : i32
    %61 = arith.addi %0, %c10_i32 : i32
    %62 = arith.index_cast %61 : i32 to index
    %63 = memref.load %arg1[%62] : memref<16xi32, #tpu.memory_space<smem>>
    %64 = arith.index_cast %63 : i32 to index
    %c0_20 = arith.constant 0 : index
    %65 = vector.load %arg2[%64, %c0_20] : memref<64x32xf32, #tpu.memory_space<vmem>>, vector<1x32xf32>
    %c10 = arith.constant 10 : index
    %c0_21 = arith.constant 0 : index
    %66 = vector.load %arg3[%c10, %c0_21] : memref<16x32xf32, #tpu.memory_space<vmem>>, vector<1x32xf32>
    tpu.vector_store %arg3[%c10, %c0_21], %65 {strides = array<i32>} : memref<16x32xf32, #tpu.memory_space<vmem>>, vector<1x32xf32>,
    %c11_i32 = arith.constant 11 : i32
    %67 = arith.addi %0, %c11_i32 : i32
    %68 = arith.index_cast %67 : i32 to index
    %69 = memref.load %arg1[%68] : memref<16xi32, #tpu.memory_space<smem>>
    %70 = arith.index_cast %69 : i32 to index
    %c0_22 = arith.constant 0 : index
    %71 = vector.load %arg2[%70, %c0_22] : memref<64x32xf32, #tpu.memory_space<vmem>>, vector<1x32xf32>
    %c11 = arith.constant 11 : index
    %c0_23 = arith.constant 0 : index
    %72 = vector.load %arg3[%c11, %c0_23] : memref<16x32xf32, #tpu.memory_space<vmem>>, vector<1x32xf32>
    tpu.vector_store %arg3[%c11, %c0_23], %71 {strides = array<i32>} : memref<16x32xf32, #tpu.memory_space<vmem>>, vector<1x32xf32>,
    %c12_i32 = arith.constant 12 : i32
    %73 = arith.addi %0, %c12_i32 : i32
    %74 = arith.index_cast %73 : i32 to index
    %75 = memref.load %arg1[%74] : memref<16xi32, #tpu.memory_space<smem>>
    %76 = arith.index_cast %75 : i32 to index
    %c0_24 = arith.constant 0 : index
    %77 = vector.load %arg2[%76, %c0_24] : memref<64x32xf32, #tpu.memory_space<vmem>>, vector<1x32xf32>
    %c12 = arith.constant 12 : index
    %c0_25 = arith.constant 0 : index
    %78 = vector.load %arg3[%c12, %c0_25] : memref<16x32xf32, #tpu.memory_space<vmem>>, vector<1x32xf32>
    tpu.vector_store %arg3[%c12, %c0_25], %77 {strides = array<i32>} : memref<16x32xf32, #tpu.memory_space<vmem>>, vector<1x32xf32>,
    %c13_i32 = arith.constant 13 : i32
    %79 = arith.addi %0, %c13_i32 : i32
    %80 = arith.index_cast %79 : i32 to index
    %81 = memref.load %arg1[%80] : memref<16xi32, #tpu.memory_space<smem>>
    %82 = arith.index_cast %81 : i32 to index
    %c0_26 = arith.constant 0 : index
    %83 = vector.load %arg2[%82, %c0_26] : memref<64x32xf32, #tpu.memory_space<vmem>>, vector<1x32xf32>
    %c13 = arith.constant 13 : index
    %c0_27 = arith.constant 0 : index
    %84 = vector.load %arg3[%c13, %c0_27] : memref<16x32xf32, #tpu.memory_space<vmem>>, vector<1x32xf32>
    tpu.vector_store %arg3[%c13, %c0_27], %83 {strides = array<i32>} : memref<16x32xf32, #tpu.memory_space<vmem>>, vector<1x32xf32>,
    %c14_i32 = arith.constant 14 : i32
    %85 = arith.addi %0, %c14_i32 : i32
    %86 = arith.index_cast %85 : i32 to index
    %87 = memref.load %arg1[%86] : memref<16xi32, #tpu.memory_space<smem>>
    %88 = arith.index_cast %87 : i32 to index
    %c0_28 = arith.constant 0 : index
    %89 = vector.load %arg2[%88, %c0_28] : memref<64x32xf32, #tpu.memory_space<vmem>>, vector<1x32xf32>
    %c14 = arith.constant 14 : index
    %c0_29 = arith.constant 0 : index
    %90 = vector.load %arg3[%c14, %c0_29] : memref<16x32xf32, #tpu.memory_space<vmem>>, vector<1x32xf32>
    tpu.vector_store %arg3[%c14, %c0_29], %89 {strides = array<i32>} : memref<16x32xf32, #tpu.memory_space<vmem>>, vector<1x32xf32>,
    %c15_i32 = arith.constant 15 : i32
    %91 = arith.addi %0, %c15_i32 : i32
    %92 = arith.index_cast %91 : i32 to index
    %93 = memref.load %arg1[%92] : memref<16xi32, #tpu.memory_space<smem>>
    %94 = arith.index_cast %93 : i32 to index
    %c0_30 = arith.constant 0 : index
    %95 = vector.load %arg2[%94, %c0_30] : memref<64x32xf32, #tpu.memory_space<vmem>>, vector<1x32xf32>
    %c15 = arith.constant 15 : index
    %c0_31 = arith.constant 0 : index
    %96 = vector.load %arg3[%c15, %c0_31] : memref<16x32xf32, #tpu.memory_space<vmem>>, vector<1x32xf32>
    tpu.vector_store %arg3[%c15, %c0_31], %95 {strides = array<i32>} : memref<16x32xf32, #tpu.memory_space<vmem>>, vector<1x32xf32>,
    return
  }
  func.func @transform_0(%arg0: i32, %arg1: memref<16xi32, #tpu.memory_space<smem>>) -> (i32, i32) {
    %c0_i32 = arith.constant 0 : i32
    %c0_i32_0 = arith.constant 0 : i32
    %c0_i32_1 = arith.constant 0 : i32
    return %c0_i32, %c0_i32_0 : i32, i32
  }
  func.func @transform_1(%arg0: i32, %arg1: memref<16xi32, #tpu.memory_space<smem>>) -> (i32, i32) {
    %c0_i32 = arith.constant 0 : i32
    %c0_i32_0 = arith.constant 0 : i32
    return %arg0, %c0_i32 : i32, i32
  }
}

</mosaic_0001>

<bundles_post_ra>
// kernel: tpu_custom_call.1
= control target key start
LH: loop header
LB: loop body
LE: loop exit
PB: predicated region body
PF: predicated region fallthrough
CT: control target
= control target key end

     0   :  { %s273_s0 = inlined_call_operand.vmem [shape: s32[16], index: 0, kind: input, shape index: {}]   ;;  %s274_s1 = inlined_call_operand.vmem [shape: f32[64,32], index: 1, kind: input, shape index: {}]   ;;  %s275_s2 = inlined_call_operand.hbm [shape: f32[16,32], index: 2, kind: output, shape index: {}]  }
   0x1   :  { %s7_s11 = sshll.u32 %s273_s0, 4  ;;  %s8_s11 = int_to_ptr.vmem [resolvable:$true] %s7_s11 }
   0x2   :  { %s148_s12 = scalar_lea.vmem %s8_s11, 16  ;;  %p153_p1 = scmp.lt.s32.totalorder %s8_s11, %s8_s11 }
   0x3   :  { %p149_p0 = scmp.ne.s32.totalorder %s8_s11, %s148_s12  ;;  %p154_p2 = scmp.lt.s32.totalorder %s148_s12, %s148_s12 }
   0x5   :  { %p155_p3 = por %p154_p2, %p153_p1 }
   0x7   :  { %p156_p4 = pnand %p155_p3, %p149_p0 }
   0x9   :  { %159 = shalt.err (!%p156_p4)  }
   0xa   :  { %s184_s13 = smov [#allocation3]  }
   0xb   :  { %10 = dma.vmem_to_smem %s8_s11, 16, %s184_s13, [#allocation2] }
   0xc   :  { %180 = dma.done.wait [#allocation2], 16 }
   0xd   :  { %181 = vsyncadd [#allocation2], 4294967280 }
   0xe   :  { %12 = sfence }
   0xf   :  { %s17_s14 = sld [smem:[#allocation3]] }
  0x10   :  { %13 = vsyncpa [#allocation5], 0  ;;  %s129_s15 = sld [smem:[#allocation3 + $0x1]]  ;;  %vm20_vm0 = vcmask 253952   ;;  %s185_s7 = smov [#allocation4]  }
  0x11   :  { %s130_s16 = sld [smem:[#allocation3 + $0x2]]  ;;  %s102_s8 = sshll.u32 %s185_s7, 4  ;;  %s103_s8 = int_to_ptr.vmem [resolvable:$true] %s102_s8 }
  0x12   :  { %s131_s17 = sld [smem:[#allocation3 + $0x3]]  ;;  %p165_p6 = scmp.lt.s32.totalorder %s103_s8, %s103_s8 }
  0x13   :  { %s132_s18 = sld [smem:[#allocation3 + $0x4]] }
  0x14   :  { %s133_s0 = sld [smem:[#allocation3 + $0x5]] }
  0x15   :  { %s18_s21 = scalar_lea.vmem %s274_s1, %s17_s14  ;;  %s134_s22 = sld [smem:[#allocation3 + $0x6]] }
  0x16   :  { %v19_v0 = vld [vmem:[%s18_s21] sm:$0x1]  ;;  %s24_s25 = scalar_lea.vmem %s274_s1, %s129_s15  ;;  %s135_s26 = sld [smem:[#allocation3 + $0x7]] }
  0x17   :  { %21 = vst.msk [vmem:[#allocation4] sm:$0x1] %vm20_vm0, %v19_v0  ;;  %v25_v1 = vld [vmem:[%s24_s25] sm:$0x1]  ;;  %s29_s29 = scalar_lea.vmem %s274_s1, %s130_s16  ;;  %s136_s30 = sld [smem:[#allocation3 + $0x8]] }
  0x18   :  { %26 = vst.msk [vmem:[#allocation4 + $0x1] sm:$0x1] %vm20_vm0, %v25_v1  ;;  %v30_v2 = vld [vmem:[%s29_s29] sm:$0x1]  ;;  %s34_s5 = scalar_lea.vmem %s274_s1, %s131_s17  ;;  %s137_s6 = sld [smem:[#allocation3 + $0x9]] }
  0x19   :  { %31 = vst.msk [vmem:[#allocation4 + $0x2] sm:$0x1] %vm20_vm0, %v30_v2  ;;  %v35_v3 = vld [vmem:[%s34_s5] sm:$0x1]  ;;  %s39_s9 = scalar_lea.vmem %s274_s1, %s132_s18  ;;  %s138_s10 = sld [smem:[#allocation3 + $0xa]] }
  0x1a   :  { %36 = vst.msk [vmem:[#allocation4 + $0x3] sm:$0x1] %vm20_vm0, %v35_v3  ;;  %v40_v4 = vld [vmem:[%s39_s9] sm:$0x1]  ;;  %s44_s13 = scalar_lea.vmem %s274_s1, %s133_s0  ;;  %s139_s14 = sld [smem:[#allocation3 + $0xb]] }
  0x1b   :  { %41 = vst.msk [vmem:[#allocation4 + $0x4] sm:$0x1] %vm20_vm0, %v40_v4  ;;  %v45_v5 = vld [vmem:[%s44_s13] sm:$0x1]  ;;  %s49_s17 = scalar_lea.vmem %s274_s1, %s134_s22  ;;  %s140_s19 = sld [smem:[#allocation3 + $0xc]] }
  0x1c   :  { %46 = vst.msk [vmem:[#allocation4 + $0x5] sm:$0x1] %vm20_vm0, %v45_v5  ;;  %v50_v6 = vld [vmem:[%s49_s17] sm:$0x1]  ;;  %s54_s21 = scalar_lea.vmem %s274_s1, %s135_s26  ;;  %s141_s23 = sld [smem:[#allocation3 + $0xd]] }
  0x1d   :  { %51 = vst.msk [vmem:[#allocation4 + $0x6] sm:$0x1] %vm20_vm0, %v50_v6  ;;  %v55_v7 = vld [vmem:[%s54_s21] sm:$0x1]  ;;  %s59_s25 = scalar_lea.vmem %s274_s1, %s136_s30  ;;  %s142_s27 = sld [smem:[#allocation3 + $0xe]] }
  0x1e   :  { %56 = vst.msk [vmem:[#allocation4 + $0x7] sm:$0x1] %vm20_vm0, %v55_v7  ;;  %v60_v8 = vld [vmem:[%s59_s25] sm:$0x1]  ;;  %s64_s29 = scalar_lea.vmem %s274_s1, %s137_s6  ;;  %s143_s3 = sld [smem:[#allocation3 + $0xf]] }
  0x1f   :  { %61 = vst.msk [vmem:[#allocation4 + $0x8] sm:$0x1] %vm20_vm0, %v60_v8  ;;  %v65_v9 = vld [vmem:[%s64_s29] sm:$0x1]  ;;  %s69_s5 = scalar_lea.vmem %s274_s1, %s138_s10 }
  0x20   :  { %66 = vst.msk [vmem:[#allocation4 + $0x9] sm:$0x1] %vm20_vm0, %v65_v9  ;;  %v70_v10 = vld [vmem:[%s69_s5] sm:$0x1]  ;;  %s74_s11 = scalar_lea.vmem %s274_s1, %s139_s14 }
  0x21   :  { %71 = vst.msk [vmem:[#allocation4 + $0xa] sm:$0x1] %vm20_vm0, %v70_v10  ;;  %v75_v11 = vld [vmem:[%s74_s11] sm:$0x1]  ;;  %s79_s13 = scalar_lea.vmem %s274_s1, %s140_s19 }
  0x22   :  { %76 = vst.msk [vmem:[#allocation4 + $0xb] sm:$0x1] %vm20_vm0, %v75_v11  ;;  %v80_v12 = vld [vmem:[%s79_s13] sm:$0x1]  ;;  %s84_s16 = scalar_lea.vmem %s274_s1, %s141_s23  ;;  %s160_s23 = scalar_lea.vmem %s103_s8, 256 }
  0x23   :  { %81 = vst.msk [vmem:[#allocation4 + $0xc] sm:$0x1] %vm20_vm0, %v80_v12  ;;  %v85_v13 = vld [vmem:[%s84_s16] sm:$0x1]  ;;  %s89_s18 = scalar_lea.vmem %s274_s1, %s142_s27  ;;  %p161_p5 = scmp.ne.s32.totalorder %s103_s8, %s160_s23 }
  0x24   :  { %86 = vst.msk [vmem:[#allocation4 + $0xd] sm:$0x1] %vm20_vm0, %v85_v13  ;;  %v90_v14 = vld [vmem:[%s89_s18] sm:$0x1]  ;;  %s94_s21 = scalar_lea.vmem %s274_s1, %s143_s3  ;;  %p166_p7 = scmp.lt.s32.totalorder %s160_s23, %s160_s23 }
  0x25   :  { %91 = vst.msk [vmem:[#allocation4 + $0xe] sm:$0x1] %vm20_vm0, %v90_v14  ;;  %v95_v15 = vld [vmem:[%s94_s21] sm:$0x1] }
  0x26   :  { %96 = vst.msk [vmem:[#allocation4 + $0xf] sm:$0x1] %vm20_vm0, %v95_v15  ;;  %p167_p8 = por %p166_p7, %p165_p6 }
  0x28   :  { %p168_p9 = pnand %p167_p8, %p161_p5 }
  0x2a   :  { %171 = shalt.err (!%p168_p9)
}
  0x2b   :  { %s186_s0 = smov 128   ;;  %s187_s24 = smov 8  }
  0x2c   :  { %108 = dma.vmem_to_hbm [thread:$0]  %s103_s8, 256, %s275_s2, [#allocation5], %s186_s0, %s186_s0, %s187_s24  }
  0x2d   :  { %182 = dma.done.wait [#allocation5], 256  }
  0x2e   :  { %183 = vsyncadd [#allocation5], 4294967040 }
  0x2f   :  { %112 = vsyncpa [#allocation5], 1 }

</bundles_post_ra>
